<compile_context>
chip_gen: v5e
topology: v5e:2x2
jax: 0.10.0
libtpu: 0.0.40
codegen_flags: <defaults>
</compile_context>

<pallas_src>
import jax
import jax.numpy as jnp
from jax.experimental import pallas as pl
from jax.experimental.pallas import tpu as pltpu


# --------------------------------------------------------------------------- #
# Kernel
# --------------------------------------------------------------------------- #
def adjust_kernel(x_ref, w1_ref, w2_ref, w3_ref, b_ref, o_ref):
    # x_ref: (Cin, TM) tile  — channels on sublanes, pixels on lanes.
    # wN_ref: (Cout, Cin) / (Cout, Cout) BN-scale-folded weights (resident).
    # b_ref: (3, Cout, 1) stacked per-layer BN biases (f32, resident).
    x = x_ref[...]                                                  # (Cin, TM)

    h = jnp.dot(w1_ref[...], x, preferred_element_type=jnp.float32)
    h = jnp.maximum(h + b_ref[0], 0.0)                              # (Cout, TM) f32

    h = jnp.dot(w2_ref[...], h.astype(w2_ref.dtype),
                preferred_element_type=jnp.float32)
    h = jnp.maximum(h + b_ref[1], 0.0)

    h = jnp.dot(w3_ref[...], h.astype(w3_ref.dtype),
                preferred_element_type=jnp.float32)
    h = jnp.maximum(h + b_ref[2], 0.0)

    o_ref[...] = h.astype(o_ref.dtype)


# --------------------------------------------------------------------------- #
# Host-side helpers
# --------------------------------------------------------------------------- #
def fold_bn(gamma, beta, mean, var, eps=1e-5):
    scale = gamma / jnp.sqrt(var + eps)
    bias = beta - mean * scale
    return scale, bias                                              # (C,), (C,)


def _vmem_capacity_bytes():
    """Physical VMEM per TensorCore; conservative v7x fallback if unqueryable."""
    try:
        cap = int(pltpu.get_tpu_info().vmem_capacity_bytes)
        if cap > 0:
            return cap
    except Exception:
        pass
    return 64 << 20


def _choose_tile(hw_pad, n_batch, target):
    """Largest multiple-of-128 divisor of hw_pad that is <= target, preferring
    >= 2 total grid steps so v7x's second TensorCore is not left idle."""
    assert hw_pad % 128 == 0
    k = hw_pad // 128
    target_k = max(1, target // 128)
    divisors = [d for d in range(1, k + 1) if k % d == 0]
    fitting = [d for d in divisors if d <= target_k] or [1]
    best = max(fitting)
    if n_batch * (k // best) < 2:                  # single-step grid: try to split
        splittable = [d for d in fitting if k // d >= 2]
        if splittable:
            best = max(splittable)
    return best * 128


def adjust_forward(x_nchw, params, *, tm=4096, io_dtype=jnp.float32):
    """x_nchw: (N, Cin, H, W). Returns (N, Cout, H, W) in io_dtype."""
    (w1, s1, b1), (w2, s2, b2), (w3, s3, b3) = params
    N, Cin, H, W = x_nchw.shape
    Cout = w1.shape[0]
    HW = H * W
    itemsize = jnp.dtype(io_dtype).itemsize

    # Fold BN scale into the (constant) conv weights; biases stay f32.
    w1f = (w1 * s1[:, None]).astype(io_dtype)
    w2f = (w2 * s2[:, None]).astype(io_dtype)
    w3f = (w3 * s3[:, None]).astype(io_dtype)
    bias = jnp.stack([b1, b2, b3]).reshape(3, Cout, 1).astype(jnp.float32)

    # Pad pixel axis to a multiple of 128 -> lane-dense, unmasked stores.
    hw_pad = ((HW + 127) // 128) * 128
    x = x_nchw.reshape(N, Cin, HW).astype(io_dtype)          # no transpose
    if hw_pad != HW:
        x = jnp.pad(x, ((0, 0), (0, 0), (0, hw_pad - HW)))

    # Per-generation VMEM budget -> tile cap, then pick the tile.
    vmem_cap = _vmem_capacity_bytes()
    per_px = itemsize * 2 * (Cin + Cout) + 4 * 2 * Cout      # dbl-buf I/O + f32 live
    tile_cap = max(128, ((vmem_cap // 4) // per_px) // 128 * 128)
    tile = _choose_tile(hw_pad, N, min(tm, tile_cap))
    grid = (N, hw_pad // tile)

    # Explicit VMEM limit so v5e's 16 MiB scoped default never constrains us,
    # while staying well under v7x's 64 MiB physical.
    weights_bytes = itemsize * (w1f.size + w2f.size + w3f.size) + 4 * bias.size
    vmem_needed = (itemsize * 2 * (Cin + Cout) * tile        # double-buffered x / out
                   + 4 * 2 * Cout * tile                     # f32 intermediates
                   + 2 * weights_bytes)
    vmem_limit = int(min(max(2 * vmem_needed, 16 << 20), vmem_cap // 2))

    flops = 2 * N * hw_pad * (Cin * Cout + 2 * Cout * Cout)
    bytes_accessed = (itemsize * (x.size + N * Cout * hw_pad) + weights_bytes)

    wmap = lambda n, i: (0, 0)

    out = pl.pallas_call(
        adjust_kernel,
        out_shape=jax.ShapeDtypeStruct((N, Cout, hw_pad), io_dtype),
        grid_spec=pltpu.PrefetchScalarGridSpec(
            num_scalar_prefetch=0,
            grid=grid,
            in_specs=[
                pl.BlockSpec((pl.Squeezed(), Cin, tile),
                             lambda n, i: (n, 0, i)),                 # x tile
                pl.BlockSpec((Cout, Cin), wmap),                      # w1 (folded)
                pl.BlockSpec((Cout, Cout), wmap),                     # w2 (folded)
                pl.BlockSpec((Cout, Cout), wmap),                     # w3 (folded)
                pl.BlockSpec((3, Cout, 1), lambda n, i: (0, 0, 0)),   # biases
            ],
            out_specs=pl.BlockSpec((pl.Squeezed(), Cout, tile),
                                   lambda n, i: (n, 0, i)),
        ),
        compiler_params=pltpu.CompilerParams(
            dimension_semantics=("parallel", "parallel"),
            vmem_limit_bytes=vmem_limit),
        cost_estimate=pl.CostEstimate(
            flops=flops, transcendentals=0, bytes_accessed=bytes_accessed),
    )(x, w1f, w2f, w3f, bias)

    if hw_pad != HW:
        out = out[:, :, :HW]
    return out.reshape(N, Cout, H, W)


# --------------------------------------------------------------------------- #
# Deterministic parameters & pure-JAX reference
# --------------------------------------------------------------------------- #
def make_params(key, in_channels, out_channels):
    """Conv weights stored as (Cout, Cin), i.e. PyTorch (Cout, Cin, 1, 1) squeezed,
    plus folded inference-mode BN (scale, bias) per block."""
    ks = jax.random.split(key, 6)

    def conv_w(k, cin, cout):
        return jax.random.normal(k, (cout, cin), jnp.float32) * (1.0 / jnp.sqrt(cin))

    def bn(k, c):
        kg, kb, km, kv = jax.random.split(k, 4)
        gamma = 1.0 + 0.1 * jax.random.normal(kg, (c,), jnp.float32)
        beta = 0.1 * jax.random.normal(kb, (c,), jnp.float32)
        mean = 0.1 * jax.random.normal(km, (c,), jnp.float32)
        var = jnp.abs(jax.random.normal(kv, (c,), jnp.float32)) + 0.5
        return fold_bn(gamma, beta, mean, var)

    w1 = conv_w(ks[0], in_channels, out_channels)
    s1, b1 = bn(ks[1], out_channels)
    w2 = conv_w(ks[2], out_channels, out_channels)
    s2, b2 = bn(ks[3], out_channels)
    w3 = conv_w(ks[4], out_channels, out_channels)
    s3, b3 = bn(ks[5], out_channels)
    return ((w1, s1, b1), (w2, s2, b2), (w3, s3, b3))


def reference_forward(x_nchw, params):
    """Pure-JAX reference in the same (C, pixels) orientation."""
    N, Cin, H, W = x_nchw.shape
    h = x_nchw.reshape(N, Cin, H * W)

    def block(h, w, s, b):
        wf = w * s[:, None]
        y = jnp.einsum('oc,ncp->nop', wf, h)
        return jnp.maximum(y + b[None, :, None], 0.0)

    for (w, s, b) in params:
        h = block(h, w, s, b)
    return h.reshape(N, -1, H, W)


# --------------------------------------------------------------------------- #
# Main
# --------------------------------------------------------------------------- #
if __name__ == "__main__":
    key = jax.random.PRNGKey(0)
    kx, kp, kx2 = jax.random.split(key, 3)

    # Case 1: batch=2, Cin=4, Cout=8, 16x16 spatial (H*W already 128-multiple).
    N, Cin, Cout, H, W = 2, 4, 8, 16, 16
    x = jax.random.normal(kx, (N, Cin, H, W), jnp.float32)
    params = make_params(kp, Cin, Cout)

    out = jax.block_until_ready(adjust_forward(x, params))
    ref = reference_forward(x, params)
    assert out.shape == (N, Cout, H, W)
    assert jnp.allclose(out, ref, atol=1e-5, rtol=1e-5)

    # Case 2: 10x10 spatial (H*W = 100) exercises the pixel-padding path.
    x2 = jax.random.normal(kx2, (1, Cin, 10, 10), jnp.float32)
    out2 = jax.block_until_ready(adjust_forward(x2, params))
    ref2 = reference_forward(x2, params)
    assert out2.shape == (1, Cout, 10, 10)
    assert jnp.allclose(out2, ref2, atol=1e-5, rtol=1e-5)

    print("KERNEL_OK")
</pallas_src>

<mosaic_0001>
module attributes {stable_mosaic.version = 11 : i64} {
  func.func @adjust_kernel(%arg0: i32, %arg1: i32, %arg2: memref<1x4x256xf32, #tpu.memory_space<vmem>>, %arg3: memref<8x4xf32, #tpu.memory_space<vmem>>, %arg4: memref<8x8xf32, #tpu.memory_space<vmem>>, %arg5: memref<8x8xf32, #tpu.memory_space<vmem>>, %arg6: memref<3x8x1xf32, #tpu.memory_space<vmem>>, %arg7: memref<1x8x256xf32, #tpu.memory_space<vmem>>) attributes {dimension_semantics = [#tpu.dimension_semantics<parallel>, #tpu.dimension_semantics<parallel>], iteration_bounds = array<i64: 2, 1>, scalar_prefetch = 0 : i64, scratch_operands = 0 : i64, tpu.core_type = #tpu.core_type<tc>, window_params = [{transform_indices = @transform_0, window_bounds = array<i64: 1, 4, 256>}, {pipeline_mode = #tpu.pipeline_mode<synchronous>, transform_indices = @transform_1, window_bounds = array<i64: 8, 4>}, {pipeline_mode = #tpu.pipeline_mode<synchronous>, transform_indices = @transform_2, window_bounds = array<i64: 8, 8>}, {pipeline_mode = #tpu.pipeline_mode<synchronous>, transform_indices = @transform_3, window_bounds = array<i64: 8, 8>}, {pipeline_mode = #tpu.pipeline_mode<synchronous>, transform_indices = @transform_4, window_bounds = array<i64: 3, 8, 1>}, {transform_indices = @transform_5, window_bounds = array<i64: 1, 8, 256>}]} {
    %c0 = arith.constant 0 : index
    %c0_0 = arith.constant 0 : index
    %c0_1 = arith.constant 0 : index
    %0 = vector.load %arg2[%c0, %c0_0, %c0_1] : memref<1x4x256xf32, #tpu.memory_space<vmem>>, vector<1x4x256xf32>
    %1 = vector.shape_cast %0 : vector<1x4x256xf32> to vector<4x256xf32>
    %c0_2 = arith.constant 0 : index
    %c0_3 = arith.constant 0 : index
    %2 = vector.load %arg3[%c0_2, %c0_3] : memref<8x4xf32, #tpu.memory_space<vmem>>, vector<8x4xf32>
    %cst = arith.constant dense<0.000000e+00> : vector<8x256xf32>
    %3 = tpu.matmul %2, %1, %cst {dimension_numbers = #tpu.dot_dimension_numbers<[1], [0], [0], [1], [0, 0, 1, 1], [], []>} : vector<8x4xf32>, vector<4x256xf32>, vector<8x256xf32> -> vector<8x256xf32>
    %c0_4 = arith.constant 0 : index
    %c0_5 = arith.constant 0 : index
    %c0_6 = arith.constant 0 : index
    %4 = vector.load %arg6[%c0_4, %c0_5, %c0_6] : memref<3x8x1xf32, #tpu.memory_space<vmem>>, vector<1x8x1xf32>
    %5 = vector.shape_cast %4 : vector<1x8x1xf32> to vector<8x1xf32>
    %6 = vector.broadcast %5 : vector<8x1xf32> to vector<8x256xf32>
    %7 = arith.addf %3, %6 : vector<8x256xf32>
    %cst_7 = arith.constant 0.000000e+00 : f32
    %8 = vector.broadcast %cst_7 : f32 to vector<8x256xf32>
    %9 = arith.maximumf %7, %8 : vector<8x256xf32>
    %c0_8 = arith.constant 0 : index
    %c0_9 = arith.constant 0 : index
    %10 = vector.load %arg4[%c0_8, %c0_9] : memref<8x8xf32, #tpu.memory_space<vmem>>, vector<8x8xf32>
    %cst_10 = arith.constant dense<0.000000e+00> : vector<8x256xf32>
    %11 = tpu.matmul %10, %9, %cst_10 {dimension_numbers = #tpu.dot_dimension_numbers<[1], [0], [0], [1], [0, 0, 1, 1], [], []>} : vector<8x8xf32>, vector<8x256xf32>, vector<8x256xf32> -> vector<8x256xf32>
    %c1 = arith.constant 1 : index
    %c0_11 = arith.constant 0 : index
    %c0_12 = arith.constant 0 : index
    %12 = vector.load %arg6[%c1, %c0_11, %c0_12] : memref<3x8x1xf32, #tpu.memory_space<vmem>>, vector<1x8x1xf32>
    %13 = vector.shape_cast %12 : vector<1x8x1xf32> to vector<8x1xf32>
    %14 = vector.broadcast %13 : vector<8x1xf32> to vector<8x256xf32>
    %15 = arith.addf %11, %14 : vector<8x256xf32>
    %cst_13 = arith.constant 0.000000e+00 : f32
    %16 = vector.broadcast %cst_13 : f32 to vector<8x256xf32>
    %17 = arith.maximumf %15, %16 : vector<8x256xf32>
    %c0_14 = arith.constant 0 : index
    %c0_15 = arith.constant 0 : index
    %18 = vector.load %arg5[%c0_14, %c0_15] : memref<8x8xf32, #tpu.memory_space<vmem>>, vector<8x8xf32>
    %cst_16 = arith.constant dense<0.000000e+00> : vector<8x256xf32>
    %19 = tpu.matmul %18, %17, %cst_16 {dimension_numbers = #tpu.dot_dimension_numbers<[1], [0], [0], [1], [0, 0, 1, 1], [], []>} : vector<8x8xf32>, vector<8x256xf32>, vector<8x256xf32> -> vector<8x256xf32>
    %c2 = arith.constant 2 : index
    %c0_17 = arith.constant 0 : index
    %c0_18 = arith.constant 0 : index
    %20 = vector.load %arg6[%c2, %c0_17, %c0_18] : memref<3x8x1xf32, #tpu.memory_space<vmem>>, vector<1x8x1xf32>
    %21 = vector.shape_cast %20 : vector<1x8x1xf32> to vector<8x1xf32>
    %22 = vector.broadcast %21 : vector<8x1xf32> to vector<8x256xf32>
    %23 = arith.addf %19, %22 : vector<8x256xf32>
    %cst_19 = arith.constant 0.000000e+00 : f32
    %24 = vector.broadcast %cst_19 : f32 to vector<8x256xf32>
    %25 = arith.maximumf %23, %24 : vector<8x256xf32>
    %c0_20 = arith.constant 0 : index
    %c0_21 = arith.constant 0 : index
    %c0_22 = arith.constant 0 : index
    %26 = vector.load %arg7[%c0_20, %c0_21, %c0_22] : memref<1x8x256xf32, #tpu.memory_space<vmem>>, vector<1x8x256xf32>
    %27 = vector.shape_cast %26 : vector<1x8x256xf32> to vector<8x256xf32>
    %28 = vector.shape_cast %25 : vector<8x256xf32> to vector<1x8x256xf32>
    tpu.vector_store %arg7[%c0_20, %c0_21, %c0_22], %28 {strides = array<i32>} : memref<1x8x256xf32, #tpu.memory_space<vmem>>, vector<1x8x256xf32>,
    return
  }
  func.func @transform_0(%arg0: i32, %arg1: i32) -> (i32, i32, i32) {
    %c0_i32 = arith.constant 0 : i32
    %c0_i32_0 = arith.constant 0 : i32
    return %arg0, %c0_i32, %arg1 : i32, i32, i32
  }
  func.func @transform_1(%arg0: i32, %arg1: i32) -> (i32, i32) {
    %c0_i32 = arith.constant 0 : i32
    %c0_i32_0 = arith.constant 0 : i32
    %c0_i32_1 = arith.constant 0 : i32
    return %c0_i32, %c0_i32_0 : i32, i32
  }
  func.func @transform_2(%arg0: i32, %arg1: i32) -> (i32, i32) {
    %c0_i32 = arith.constant 0 : i32
    %c0_i32_0 = arith.constant 0 : i32
    %c0_i32_1 = arith.constant 0 : i32
    return %c0_i32, %c0_i32_0 : i32, i32
  }
  func.func @transform_3(%arg0: i32, %arg1: i32) -> (i32, i32) {
    %c0_i32 = arith.constant 0 : i32
    %c0_i32_0 = arith.constant 0 : i32
    %c0_i32_1 = arith.constant 0 : i32
    return %c0_i32, %c0_i32_0 : i32, i32
  }
  func.func @transform_4(%arg0: i32, %arg1: i32) -> (i32, i32, i32) {
    %c0_i32 = arith.constant 0 : i32
    %c0_i32_0 = arith.constant 0 : i32
    %c0_i32_1 = arith.constant 0 : i32
    %c0_i32_2 = arith.constant 0 : i32
    return %c0_i32, %c0_i32_0, %c0_i32_1 : i32, i32, i32
  }
  func.func @transform_5(%arg0: i32, %arg1: i32) -> (i32, i32, i32) {
    %c0_i32 = arith.constant 0 : i32
    %c0_i32_0 = arith.constant 0 : i32
    return %arg0, %c0_i32, %arg1 : i32, i32, i32
  }
}

</mosaic_0001>

<bundles_post_ra>
// kernel: tpu_custom_call.1
= control target key start
LH: loop header
LB: loop body
LE: loop exit
PB: predicated region body
PF: predicated region fallthrough
CT: control target
= control target key end

     0   :  { %10 = vsyncpa [#allocation3], 0  ;;  %s834_s0 = inlined_call_operand.vmem [shape: f32[2,4,256], index: 0, kind: input, shape index: {}]   ;;  %s835_s1 = inlined_call_operand.vmem [shape: f32[8,4], index: 1, kind: input, shape index: {}]   ;;  %s836_s2 = inlined_call_operand.vmem [shape: f32[8,8], index: 2, kind: input, shape index: {}]   ;;  %s837_s3 = inlined_call_operand.vmem [shape: f32[8,8], index: 3, kind: input, shape index: {}]   ;;  %s838_s4 = inlined_call_operand.vmem [shape: f32[3,8,1], index: 4, kind: input, shape index: {}]   ;;  %s839_s5 = inlined_call_operand.hbm [shape: f32[2,8,256], index: 5, kind: output, shape index: {}]  }
   0x1   :  { %12 = vsyncpa [#allocation3 + $0x1], 0  ;;  %s715_s18 = smov 0   ;;  %s717_s19 = smov 0  }
   0x2   :  { %s719_s20 = smov 0   ;;  %s721_s21 = smov 0  }
   0x3   :  { %s723_s22 = smov 0   ;;  %s725_s23 = smov 0  }
   0x4 LB: > { %s521_s24 = sadd.s32 4294967295, %s682_s23   ;;  %s522_s25 = sadd.s32 4294967294, %s682_s23   ;;  %s682_s23 = sphi %s725_s23, %s18_s23   ;;  %s678_s22 = sphi %s723_s22, %s846_s22   ;;  %s674_s21 = sphi %s721_s21, %s845_s21   ;;  %s670_s20 = sphi %s719_s20, %s844_s20   ;;  %s666_s19 = sphi %s717_s19, %s843_s19   ;;  %s662_s18 = sphi %s715_s18, %s842_s18  }
   0x5   : > { %s30_s26 = sadd.s32 1, %s678_s22  ;;  %s151_s27 = sadd.s32 1, %s670_s20 }
   0x6   : > { %p32_p0 = scmp.ge.s32.totalorder %s30_s26, 2  ;;  %p161_p1 = scmp.ne.s32.totalorder %s670_s20, %s666_s19 }
   0x7   : > { %p162_p2 = scmp.eq.s32.totalorder %s521_s24, 1  ;;  %p167_p3 = scmp.ne.s32.totalorder %s666_s19, %s662_s18 }
   0x8   : > { %s848_s26 = smov (%p32_p0, %s30_s26), 0  ;;  %p168_p5 = scmp.eq.s32.totalorder %s522_s25, 1 }
   0x9   : > { %p755_p4 = por %p162_p2, %p161_p1  ;;  %s146_s29 = ssub.s32 %s678_s22, %s848_s26 }
   0xa   : > { %p525_p6 = scmp.ge.s32.totalorder %s682_s23, 1  ;;  %p149_p7 = scmp.eq.s32.totalorder %s146_s29, 0 }
   0xb   : > { %p762_p8 = por %p168_p5, %p167_p3  ;;  %p211_p9 = scmp.lt.s32.totalorder %s682_s23, 3 }
   0xc   : > { %s768_s6 = scalar_select %p149_p7, %s670_s20, %s151_s27  }
   0xd   : > { %p212_p10 = pnand %p525_p6, %p211_p9 }
   0xe   : > { %p244_p11 = scmp.lt.s32.totalorder (!%p212_p10), %s674_s21, 1  ;;  %s545_s11 = sshll.u32 (!%p212_p10), %s674_s21, 4 }
   0xf   : > { %215 = sbr.rel (%p212_p10) target bundleno = 436 (0x1b4), region = 40  ;;  %s440_s14 = scalar_lea.hbm (!%p212_p10), %s839_s5, %s545_s11 }
  0x10   : > { %s444_s17 = sshll.u32 (!%p212_p10), %s440_s14, 4  ;;  %s624_s7 = scalar_lea.hbm (!%p212_p10), %s839_s5, 32  ;;  %s445_s17 = int_to_ptr.hbm [resolvable:$true] %s444_s17 }
  0x11   : > { %s618_s24 = sshra.s32 (!%p212_p10), %s445_s17, 4  ;;  %s619_s24 = int_to_ptr.hbm [resolvable:$true] %s618_s24 }
  0x12   : > { %s620_s25 = scalar_lea.hbm (!%p212_p10), %s619_s24, 16  ;;  %p625_p1 = scmp.lt.s32.totalorder (!%p212_p10), %s619_s24, %s839_s5 }
  0x13   : > { %p621_p12 = scmp.ne.s32.totalorder (!%p212_p10), %s619_s24, %s620_s25  ;;  %p626_p2 = scmp.lt.s32.totalorder (!%p212_p10), %s624_s7, %s620_s25 }
  0x14   : > { %v256_v0 = vld [vmem:[%s838_s4] sm:$0xff]  ;;  %v684_v1 = vmov 0   ;;  %s245_s9 = scalar_select %p244_p11, %s674_s21, 1  ;;  %v533_v3 = vld [vmem:[%s838_s4 + $0x8] sm:$0xff]  ;;  %vm270_vm0 = vcmask 1043456   ;;  %vm266_vm1 = vcmask 31744  }
  0x15   : > { %602 = vset.pattern.permute.xlu0 %v684_v1  ;;  %603 = vset.pattern.permute.xlu1 %v684_v1  ;;  %v255_v4 = vld [vmem:[%s835_s1] sm:$0xff]  ;;  %vm325_vm2 = vcmask 64512   ;;  %v536_v15 = vld [vmem:[%s838_s4 + $0x10] sm:$0xff]  ;;  %p622_p13 = pnand %p621_p12, %p755_p4  ;;  %p627_p3 = por %p626_p2, %p625_p1 }
  0x16   : > { %259 = vperm.xlu0 %602, %v256_v0   ;;  %s544_s10 = sshll.u32 %s245_s9, 3  ;;  %v317_v14 = vld [vmem:[%s836_s2] sm:$0xff]  ;;  %376 = vperm.xlu1 %603, %v536_v15   ;;  %s240_s9 = sand.u32 1, %s666_s19  }
  0x17   : > { %s251_s13 = scalar_lea.vmem %s834_s0, %s544_s10  ;;  %v371_v23 = vld [vmem:[%s837_s3] sm:$0xff]  ;;  %s526_s10 = sshll.u32 %s240_s9, 4 }
  0x18   : > { %v254_v2 = vld [vmem:[%s251_s13] sm:$0xff]  ;;  %s242_s15 = scalar_lea.vmem [#allocation2], %s526_s10  ;;  %s427_s21 = scalar_lea.sflag [#allocation3], %s240_s9 }
  0x19   : > { %263 = vst [vmem:[#allocation1] ss:$2 sm:$0xff] %v254_v2  ;;  %s442_s16 = sshll.u32 %s242_s15, 4  ;;  %p623_p0 = pneg %p622_p13  ;;  %s443_s16 = int_to_ptr.vmem [resolvable:$true] %s442_s16 }
  0x1b   : > { %p628_p5 = pnand %p627_p3, %p623_p0 }
  0x1e   : > { %322 = vperm.xlu0 %602, %v533_v3  }
  0x20   : > { %v264_v5 = vld.sshfl [vmem:[#allocation1] sm:$0xff pattern:$0x75316420]  ;;  %v265_v6 = vld.sshfl [vmem:[#allocation1 + $0x8] sm:$0xff pattern:$0x75316420] }
  0x21   : > { %529 = vmatpush.msk.msra.mxu0 %vm270_vm0, %v264_v5  ;;  %531 = vmatpush.msk.msra.mxu1 %vm270_vm0, %v265_v6 }
  0x22   : > { %530 = vmatmul.msk.f32.vlgmr.msra.gmra.mxu0 %vm266_vm1, %v255_v4  ;;  %532 = vmatmul.msk.f32.vlgmr.msra.gmra.mxu1 %vm266_vm1, %v255_v4 }
  0x88   : > { %v260_v7 = vpop.permute.xlu0 %259  ;;  %v377_v24 = vpop.permute.xlu1 %376 }
  0x90   : > { %v323_v16 = vpop.permute.xlu0 %322 }
  0x9f   : > { %v292_v8 = vpop.f32.mrf.mxu0  ;;  %v312_v9 = vpop.f32.mrf.mxu1 }
  0xa0   : > { %v293_v10 = vadd.f32 %v292_v8, %v260_v7  ;;  %v313_v11 = vadd.f32 %v312_v9, %v260_v7 }
  0xa2   : > { %v315_v12 = vmax.f32 %v293_v10, 0.0  ;;  %v316_v13 = vmax.f32 %v313_v11, 0.0 }
  0xa4   : > { %344 = vmatpush.msra.mxu2 %v315_v12  ;;  %364 = vmatpush.msra.mxu3 %v316_v13 }
  0xa5   : > { %534 = vmatmul.msk.f32.vlgmr.msra.gmra.mxu2 %vm325_vm2, %v317_v14  ;;  %535 = vmatmul.msk.f32.vlgmr.msra.gmra.mxu3 %vm325_vm2, %v317_v14 }
 0x128   : > { %v346_v17 = vpop.f32.mrf.mxu2  ;;  %v366_v18 = vpop.f32.mrf.mxu3 }
 0x129   : > { %v347_v19 = vadd.f32 %v346_v17, %v323_v16  ;;  %v367_v20 = vadd.f32 %v366_v18, %v323_v16 }
 0x12b   : > { %v369_v21 = vmax.f32 %v347_v19, 0.0  ;;  %v370_v22 = vmax.f32 %v367_v20, 0.0 }
 0x12d   : > { %397 = vmatpush.msrb.mxu0 %v369_v21  ;;  %417 = vmatpush.msrb.mxu1 %v370_v22 }
 0x12e   : > { %537 = vmatmul.msk.f32.vlgmr.msrb.gmra.mxu0 %vm325_vm2, %v371_v23  ;;  %538 = vmatmul.msk.f32.vlgmr.msrb.gmra.mxu1 %vm325_vm2, %v371_v23 }
 0x1ab   : > { %v399_v25 = vpop.f32.mrf.mxu0  ;;  %v419_v26 = vpop.f32.mrf.mxu1 }
 0x1ac   : > { %v400_v27 = vadd.f32 %v399_v25, %v377_v24  ;;  %v420_v28 = vadd.f32 %v419_v26, %v377_v24 }
 0x1ae   : > { %v422_v29 = vmax.f32 %v400_v27, 0.0  ;;  %v423_v30 = vmax.f32 %v420_v28, 0.0 }
 0x1b0   : > { %424 = vst [vmem:[%s242_s15] sm:$0xff] %v422_v29 }
 0x1b1   : > { %425 = vst [vmem:[%s242_s15 + $0x8] sm:$0xff] %v423_v30 }
 0x1b2   : > { %631 = shalt.err (!%p628_p5)
}
 0x1b3   : > { %546 = dma.vmem_to_hbm [thread:$0]  (%p755_p4), %s443_s16, 256, %s445_s17, %s427_s21  }
 0x1b4 PF: > { %p552_p6 = scmp.ge.s32.totalorder %s682_s23, 2  ;;  %s456_s9 = sand.u32 1, %s662_s18  }
 0x1b5   : > { %s457_s11 = scalar_lea.sflag [#allocation3], %s456_s9 }
 0x1b6   : > { %p549_p7 = pnand %p552_p6, %p762_p8 }
 0x1b8   : > { %p550_p9 = pneg %p549_p7 }
 0x1ba   : > { %657 = dma.done.wait (%p550_p9), %s457_s11, 256  }
 0x1bb   : > { %659 = vsyncadd (%p550_p9), %s457_s11, 4294967040  ;;  %s18_s23 = sadd.s32 1, %s682_s23   ;;  %s842_s18 = smov %s666_s19 }
 0x1bc   : > { %p15_p10 = scmp.ge.s32.totalorder %s18_s23, 4   ;;  %s843_s19 = smov %s670_s20 }
 0x1bd   : > { %s844_s20 = smov %s768_s6  ;;  %s845_s21 = smov %s678_s22 }
 0x1be   : > { %s846_s22 = smov %s848_s26  ;;  %17 = sbr.rel (!%p15_p10) target bundleno = 4 (0x4), region = 77 }
 0x1c3   :  { %463 = vsyncpa [#allocation3], 1 }
 0x1c4   :  { %465 = vsyncpa [#allocation3 + $0x1], 1 }

</bundles_post_ra>
